<compile_context>
chip_gen: v7x
topology: tpu7x:2x2x1
jax: 0.10.0
libtpu: 0.0.40
codegen_flags: <defaults>
</compile_context>

<pallas_src>
import functools

import jax
import jax.numpy as jnp
from jax.experimental import pallas as pl
from jax.experimental.pallas import tpu as pltpu


def _round_up(x, m):
    return ((x + m - 1) // m) * m


@functools.lru_cache(maxsize=1)
def _tpu_vmem_and_kind():
    """Best-effort query of per-TensorCore VMEM bytes and device generation."""
    kind = ""
    try:
        kind = jax.devices()[0].device_kind.lower()
    except Exception:
        pass
    vmem = None
    try:
        vmem = int(pltpu.get_tpu_info().vmem_capacity_bytes)
    except Exception:
        vmem = None
    if not vmem:
        vmem = (64 << 20) if "v7" in kind else (128 << 20)
    return vmem, kind


def _mixtral_mlp_kernel(x_ref, wg_ref, wu_ref, wd_ref, o_ref, acc_ref):
    """Grid step (i, j): token tile i (parallel, outer), ffn tile j (reduction, innermost).

    Computes the partial contribution of ffn slice j to the down projection and
    accumulates it in an f32 VMEM scratch that stays resident across the j axis.
    """
    j = pl.program_id(1)

    @pl.when(j == 0)
    def _():
        acc_ref[...] = jnp.zeros_like(acc_ref)

    x = x_ref[...]                                                    # [tm, H] bf16
    # gate and up share the same LHS; two dots, consume g immediately (no wide
    # f32 gu slab to spill/re-read).
    g = jnp.dot(x, wg_ref[...], preferred_element_type=jnp.float32)   # [tm, tf] f32
    h = g * jax.nn.sigmoid(g)                                         # SiLU(gate)
    u = jnp.dot(x, wu_ref[...], preferred_element_type=jnp.float32)   # [tm, tf] f32
    h = h * u
    # bf16 cast before the down matmul matches torch bf16 Linear semantics.
    acc_ref[...] += jnp.dot(h.astype(wd_ref.dtype), wd_ref[...],
                            preferred_element_type=jnp.float32)        # [tm, H] f32

    @pl.when(j == pl.num_programs(1) - 1)
    def _():
        o_ref[...] = acc_ref[...].astype(o_ref.dtype)


def _choose_tiles(T, H, F, vmem_bytes, kind):
    """Generation-aware (tm, tf) that fill the MXU, amortize weight streaming,
    and fit the queried per-TensorCore VMEM capacity."""
    if vmem_bytes <= (96 << 20):
        # v7x-class (64 MiB/TC, ~310 FLOP/B crossover): tm=512 is safely compute-bound.
        tm_cap, weight_budget = 512, 28 << 20
    elif ("v5e" in kind) or ("v5 lite" in kind) or ("v5lite" in kind):
        # v5e (~240 FLOP/B crossover): tm=256 is already past the roofline knee;
        # spend the 128 MiB on bigger weight slabs (tf=1024) instead.
        tm_cap, weight_budget = 256, 72 << 20
    else:
        # v6e-class 128 MiB parts (~640 FLOP/B crossover): tall token tiles.
        tm_cap, weight_budget = 1024, 28 << 20
    weight_budget = min(weight_budget, int(vmem_bytes * 0.5))

    # bf16 sublane packing is (16, 128): round the token tile to 16.
    tm = min(tm_cap, _round_up(T, 16))

    # 12*H*tf bytes = double-buffered bf16 weight slabs: gate (H,tf) + up (H,tf) + down (tf,H).
    cands = [c for c in (2048, 1024, 512, 256, 128)
             if F % c == 0 and 12 * H * c <= weight_budget]
    tf = max(cands) if cands else F  # TODO(synk): arbitrary F with no 128-multiple divisor may still overflow VMEM.

    def footprint(tm_, tf_):
        return (12 * H * tf_          # weight slabs (double-buffered bf16)
                + 4 * tm_ * H * 2     # x + out tiles (double-buffered bf16)
                + tm_ * H * 4)        # f32 accumulator scratch

    budget = int(vmem_bytes * 0.8)
    while footprint(tm, tf) > budget and tf > 128 and tf % 2 == 0 and F % (tf // 2) == 0:
        tf //= 2
    while footprint(tm, tf) > budget and tm > 16:
        tm = max(16, _round_up(tm // 2, 16))
    return tm, tf, footprint(tm, tf)


@jax.jit
def mixtral_block_sparse_top2_mlp(x, w_gate, w_up, w_down):
    """x: [T, H] bf16; w_gate/w_up: [H, F] bf16; w_down: [F, H] bf16.
    Returns (silu(x @ w_gate) * (x @ w_up)) @ w_down, bf16."""
    T, H = x.shape
    F = w_gate.shape[1]
    vmem_bytes, kind = _tpu_vmem_and_kind()
    tm, tf, vmem_est = _choose_tiles(T, H, F, vmem_bytes, kind)
    nf = F // tf

    # Ragged per-expert token counts: pad to a multiple of tm (zero rows give
    # exactly zero output) and slice the result back.
    T_pad = _round_up(T, tm)
    if T_pad != T:
        x = jnp.pad(x, ((0, T_pad - T), (0, 0)))

    grid = (T_pad // tm, nf)

    # Explicit VMEM budget tied to the queried capacity (never above physical).
    vmem_limit = int(min(vmem_est + (16 << 20), vmem_bytes - (2 << 20)))

    # TODO(synk): on v7x, decode-sized T gives grid=(1, nf) so only one of the two
    # TensorCores runs; splitting the F reduction (per-core partial sums) or the
    # output H dim across cores would recover the idle core's HBM bandwidth.
    out = pl.pallas_call(
        _mixtral_mlp_kernel,
        out_shape=jax.ShapeDtypeStruct((T_pad, H), x.dtype),
        grid_spec=pltpu.PrefetchScalarGridSpec(
            num_scalar_prefetch=0,
            grid=grid,
            in_specs=[
                pl.BlockSpec((tm, H), lambda i, j: (i, 0)),   # token tile (resident over j)
                pl.BlockSpec((H, tf), lambda i, j: (0, j)),   # gate-proj weight slab
                pl.BlockSpec((H, tf), lambda i, j: (0, j)),   # up-proj weight slab
                pl.BlockSpec((tf, H), lambda i, j: (j, 0)),   # down-proj weight slab
            ],
            out_specs=pl.BlockSpec((tm, H), lambda i, j: (i, 0)),
            scratch_shapes=[pltpu.VMEM((tm, H), jnp.float32)],
        ),
        compiler_params=pltpu.CompilerParams(
            dimension_semantics=("parallel", "arbitrary"),
            vmem_limit_bytes=vmem_limit,
        ),
    )(x, w_gate, w_up, w_down)

    return out[:T] if T_pad != T else out


def _reference(x, w_gate, w_up, w_down):
    xf = x.astype(jnp.float32)
    g = xf @ w_gate.astype(jnp.float32)
    u = xf @ w_up.astype(jnp.float32)
    h = jax.nn.silu(g) * u
    return (h @ w_down.astype(jnp.float32)).astype(x.dtype)


if __name__ == "__main__":
    # Small, Mixtral-shaped-but-tiny config.
    hidden_dim = 128   # H
    ffn_dim = 512      # F
    tokens = 20        # T (non-multiple-of-16 to exercise the ragged/pad path)

    key = jax.random.PRNGKey(0)
    kx, kg, ku, kd = jax.random.split(key, 4)

    x = (jax.random.normal(kx, (tokens, hidden_dim), jnp.float32) * 0.5
         ).astype(jnp.bfloat16)
    # Deterministic synthetic weights (stand-ins for w1/w3/w2 of the expert).
    w_gate = (jax.random.normal(kg, (hidden_dim, ffn_dim), jnp.float32)
              * (1.0 / hidden_dim ** 0.5)).astype(jnp.bfloat16)
    w_up = (jax.random.normal(ku, (hidden_dim, ffn_dim), jnp.float32)
            * (1.0 / hidden_dim ** 0.5)).astype(jnp.bfloat16)
    w_down = (jax.random.normal(kd, (ffn_dim, hidden_dim), jnp.float32)
              * (1.0 / ffn_dim ** 0.5)).astype(jnp.bfloat16)

    out = mixtral_block_sparse_top2_mlp(x, w_gate, w_up, w_down)
    out = jax.block_until_ready(out)

    ref = _reference(x, w_gate, w_up, w_down)
    err = jnp.max(jnp.abs(out.astype(jnp.float32) - ref.astype(jnp.float32)))
    assert out.shape == (tokens, hidden_dim) and out.dtype == jnp.bfloat16
    assert float(err) < 5e-2, f"max abs err too large: {err}"

    print("KERNEL_OK")
</pallas_src>

<mosaic_0001>
module attributes {stable_mosaic.version = 11 : i64} {
  func.func @_mixtral_mlp_kernel(%arg0: i32, %arg1: i32, %arg2: memref<32x128xbf16, #tpu.memory_space<vmem>>, %arg3: memref<128x512xbf16, #tpu.memory_space<vmem>>, %arg4: memref<128x512xbf16, #tpu.memory_space<vmem>>, %arg5: memref<512x128xbf16, #tpu.memory_space<vmem>>, %arg6: memref<32x128xbf16, #tpu.memory_space<vmem>>, %arg7: memref<32x128xf32, #tpu.memory_space<vmem>>) attributes {dimension_semantics = [#tpu.dimension_semantics<parallel>, #tpu.dimension_semantics<arbitrary>], iteration_bounds = array<i64: 1, 1>, scalar_prefetch = 0 : i64, scratch_operands = 1 : i64, tpu.core_type = #tpu.core_type<tc>, window_params = [{transform_indices = @transform_0, window_bounds = array<i64: 32, 128>}, {transform_indices = @transform_1, window_bounds = array<i64: 128, 512>}, {transform_indices = @transform_2, window_bounds = array<i64: 128, 512>}, {transform_indices = @transform_3, window_bounds = array<i64: 512, 128>}, {transform_indices = @transform_4, window_bounds = array<i64: 32, 128>}]} {
    %c0_i32 = arith.constant 0 : i32
    %0 = arith.cmpi eq, %arg1, %c0_i32 : i32
    %1 = arith.extui %0 : i1 to i32
    %c0_i32_0 = arith.constant 0 : i32
    %2 = arith.cmpi ne, %1, %c0_i32_0 : i32
    scf.if %2 {
      %cst_17 = arith.constant 0.000000e+00 : f32
      %24 = vector.broadcast %cst_17 : f32 to vector<32x128xf32>
      %c0_18 = arith.constant 0 : index
      %c0_19 = arith.constant 0 : index
      %25 = vector.load %arg7[%c0_18, %c0_19] : memref<32x128xf32, #tpu.memory_space<vmem>>, vector<32x128xf32>
      tpu.vector_store %arg7[%c0_18, %c0_19], %24 {strides = array<i32>} : memref<32x128xf32, #tpu.memory_space<vmem>>, vector<32x128xf32>,
    } else {
    }
    %c0 = arith.constant 0 : index
    %c0_1 = arith.constant 0 : index
    %3 = vector.load %arg2[%c0, %c0_1] : memref<32x128xbf16, #tpu.memory_space<vmem>>, vector<32x128xbf16>
    %c0_2 = arith.constant 0 : index
    %c0_3 = arith.constant 0 : index
    %4 = vector.load %arg3[%c0_2, %c0_3] : memref<128x512xbf16, #tpu.memory_space<vmem>>, vector<128x512xbf16>
    %cst = arith.constant dense<0.000000e+00> : vector<32x512xf32>
    %5 = tpu.matmul %3, %4, %cst {dimension_numbers = #tpu.dot_dimension_numbers<[1], [0], [0], [1], [0, 0, 1, 1], [], []>} : vector<32x128xbf16>, vector<128x512xbf16>, vector<32x512xf32> -> vector<32x512xf32>
    %6 = arith.negf %5 : vector<32x512xf32>
    %7 = math.exp %6 : vector<32x512xf32>
    %cst_4 = arith.constant 1.000000e+00 : f32
    %8 = vector.broadcast %cst_4 : f32 to vector<32x512xf32>
    %9 = arith.addf %8, %7 : vector<32x512xf32>
    %10 = arith.divf %8, %9 : vector<32x512xf32>
    %11 = arith.mulf %5, %10 : vector<32x512xf32>
    %c0_5 = arith.constant 0 : index
    %c0_6 = arith.constant 0 : index
    %12 = vector.load %arg4[%c0_5, %c0_6] : memref<128x512xbf16, #tpu.memory_space<vmem>>, vector<128x512xbf16>
    %cst_7 = arith.constant dense<0.000000e+00> : vector<32x512xf32>
    %13 = tpu.matmul %3, %12, %cst_7 {dimension_numbers = #tpu.dot_dimension_numbers<[1], [0], [0], [1], [0, 0, 1, 1], [], []>} : vector<32x128xbf16>, vector<128x512xbf16>, vector<32x512xf32> -> vector<32x512xf32>
    %14 = arith.mulf %11, %13 : vector<32x512xf32>
    %c0_8 = arith.constant 0 : index
    %c0_9 = arith.constant 0 : index
    %15 = vector.load %arg7[%c0_8, %c0_9] : memref<32x128xf32, #tpu.memory_space<vmem>>, vector<32x128xf32>
    %16 = arith.truncf %14 : vector<32x512xf32> to vector<32x512xbf16>
    %c0_10 = arith.constant 0 : index
    %c0_11 = arith.constant 0 : index
    %17 = vector.load %arg5[%c0_10, %c0_11] : memref<512x128xbf16, #tpu.memory_space<vmem>>, vector<512x128xbf16>
    %cst_12 = arith.constant dense<0.000000e+00> : vector<32x128xf32>
    %18 = tpu.matmul %16, %17, %cst_12 {dimension_numbers = #tpu.dot_dimension_numbers<[1], [0], [0], [1], [0, 0, 1, 1], [], []>} : vector<32x512xbf16>, vector<512x128xbf16>, vector<32x128xf32> -> vector<32x128xf32>
    %19 = arith.addf %15, %18 : vector<32x128xf32>
    %c0_13 = arith.constant 0 : index
    %c0_14 = arith.constant 0 : index
    %20 = vector.load %arg7[%c0_13, %c0_14] : memref<32x128xf32, #tpu.memory_space<vmem>>, vector<32x128xf32>
    tpu.vector_store %arg7[%c0_13, %c0_14], %19 {strides = array<i32>} : memref<32x128xf32, #tpu.memory_space<vmem>>, vector<32x128xf32>,
    %c0_i32_15 = arith.constant 0 : i32
    %21 = arith.cmpi eq, %arg1, %c0_i32_15 : i32
    %22 = arith.extui %21 : i1 to i32
    %c0_i32_16 = arith.constant 0 : i32
    %23 = arith.cmpi ne, %22, %c0_i32_16 : i32
    scf.if %23 {
      %c0_17 = arith.constant 0 : index
      %c0_18 = arith.constant 0 : index
      %24 = vector.load %arg7[%c0_17, %c0_18] : memref<32x128xf32, #tpu.memory_space<vmem>>, vector<32x128xf32>
      %25 = arith.truncf %24 : vector<32x128xf32> to vector<32x128xbf16>
      %c0_19 = arith.constant 0 : index
      %c0_20 = arith.constant 0 : index
      %26 = vector.load %arg6[%c0_19, %c0_20] : memref<32x128xbf16, #tpu.memory_space<vmem>>, vector<32x128xbf16>
      tpu.vector_store %arg6[%c0_19, %c0_20], %25 {strides = array<i32>} : memref<32x128xbf16, #tpu.memory_space<vmem>>, vector<32x128xbf16>,
    } else {
    }
    return
  }
  func.func @transform_0(%arg0: i32, %arg1: i32) -> (i32, i32) {
    %c0_i32 = arith.constant 0 : i32
    %c0_i32_0 = arith.constant 0 : i32
    return %arg0, %c0_i32 : i32, i32
  }
  func.func @transform_1(%arg0: i32, %arg1: i32) -> (i32, i32) {
    %c0_i32 = arith.constant 0 : i32
    %c0_i32_0 = arith.constant 0 : i32
    return %c0_i32, %arg1 : i32, i32
  }
  func.func @transform_2(%arg0: i32, %arg1: i32) -> (i32, i32) {
    %c0_i32 = arith.constant 0 : i32
    %c0_i32_0 = arith.constant 0 : i32
    return %c0_i32, %arg1 : i32, i32
  }
  func.func @transform_3(%arg0: i32, %arg1: i32) -> (i32, i32) {
    %c0_i32 = arith.constant 0 : i32
    %c0_i32_0 = arith.constant 0 : i32
    return %arg1, %c0_i32 : i32, i32
  }
  func.func @transform_4(%arg0: i32, %arg1: i32) -> (i32, i32) {
    %c0_i32 = arith.constant 0 : i32
    %c0_i32_0 = arith.constant 0 : i32
    return %arg0, %c0_i32 : i32, i32
  }
}

</mosaic_0001>

<bundles_post_ra>
// kernel: mixtral_block_sparse_top2_mlp.1
= control target key start
LH: loop header
LB: loop body
LE: loop exit
PB: predicated region body
PF: predicated region fallthrough
CT: control target
= control target key end

     0   :  { %9 = vsyncpa [#allocation4], 0  ;;  %s1841_s0 = inlined_call_operand.vmem [shape: bf16[32,128], index: 0, kind: input, shape index: {}]   ;;  %s1842_s1 = inlined_call_operand.hbm [shape: bf16[128,512], index: 1, kind: input, shape index: {}]   ;;  %s1843_s2 = inlined_call_operand.hbm [shape: bf16[128,512], index: 2, kind: input, shape index: {}]   ;;  %s1844_s3 = inlined_call_operand.hbm [shape: bf16[512,128], index: 3, kind: input, shape index: {}]   ;;  %s1845_s4 = inlined_call_operand.vmem [shape: bf16[32,128], index: 4, kind: output, shape index: {}]  }
   0x1   :  { %10 = vsyncpa [#allocation6], 0  ;;  %s1675_s15 = smov [#allocation5]   ;;  %s1676_s17 = smov [#allocation3]  }
   0x2   :  { %s30_s16 = sshll.u32 %s1675_s15, 4  ;;  %s18_s18 = sshll.u32 %s1676_s17, 4  ;;  %s31_s16 = int_to_ptr.vmem [resolvable:$true] %s30_s16  ;;  %s1708_s18 = int_to_ptr.vmem [resolvable:$true] %s18_s18 }
   0x3   :  { %s1605_s21 = scalar_lea.hbm %s1843_s2, 4096 }
   0x4   :  { %p1606_p0 = scmp.ne.s32.totalorder %s1843_s2, %s1605_s21  ;;  %p1609_p1 = scmp.lt.u32.totalorder %s1605_s21, %s1843_s2 }
   0x6   :  { %p1611_p2 = pnand %p1609_p1, %p1606_p0 }
   0x8   :  { %1614 = shalt.err (!%p1611_p2)
}
   0x9   :  { %s1615_s26 = scalar_lea.vmem %s31_s16, 4096  ;;  %p1620_p4 = scmp.lt.s32.totalorder %s31_s16, %s31_s16 }
   0xa   :  { %p1616_p3 = scmp.ne.s32.totalorder %s31_s16, %s1615_s26  ;;  %p1621_p5 = scmp.lt.s32.totalorder %s1615_s26, %s1615_s26 }
   0xc   :  { %p1622_p6 = por %p1621_p5, %p1620_p4 }
   0xe   :  { %p1623_p7 = pnand %p1622_p6, %p1616_p3 }
  0x10   :  { %1626 = shalt.err (!%p1623_p7)
}
  0x11   :  { %s1677_s27 = smov 256   ;;  %s1678_s28 = smov 16  }
  0x12   :  { %36 = dma.hbm_to_vmem [thread:$0]  %s1843_s2, 4096, %s31_s16, [#allocation6], %s1677_s27, %s1677_s27, %s1678_s28  }
  0x13   :  { %s1627_s7 = scalar_lea.hbm %s1842_s1, 4096 }
  0x14   :  { %p1628_p8 = scmp.ne.s32.totalorder %s1842_s1, %s1627_s7  ;;  %p1631_p9 = scmp.lt.u32.totalorder %s1627_s7, %s1842_s1 }
  0x16   :  { %p1633_p10 = pnand %p1631_p9, %p1628_p8 }
  0x18   :  { %1636 = shalt.err (!%p1633_p10)
}
  0x19   :  { %s1637_s12 = scalar_lea.vmem %s1708_s18, 4096  ;;  %p1642_p12 = scmp.lt.s32.totalorder %s1708_s18, %s1708_s18 }
  0x1a   :  { %p1638_p11 = scmp.ne.s32.totalorder %s1708_s18, %s1637_s12  ;;  %p1643_p13 = scmp.lt.s32.totalorder %s1637_s12, %s1637_s12 }
  0x1c   :  { %p1644_p0 = por %p1643_p13, %p1642_p12 }
  0x1e   :  { %p1645_p1 = pnand %p1644_p0, %p1638_p11 }
  0x20   :  { %1648 = shalt.err (!%p1645_p1)
}
  0x21   :  { %24 = dma.hbm_to_vmem [thread:$0]  %s1842_s1, 4096, %s1708_s18, [#allocation4], %s1677_s27, %s1677_s27, %s1678_s28  }
  0x22   :  { %s1679_s14 = smov [#allocation7]   ;;  %s1649_s19 = scalar_lea.hbm %s1844_s3, 4096 }
  0x23   :  { %s42_s15 = sshll.u32 %s1679_s14, 4  ;;  %p1650_p2 = scmp.ne.s32.totalorder %s1844_s3, %s1649_s19  ;;  %s43_s15 = int_to_ptr.vmem [resolvable:$true] %s42_s15 }
  0x24   :  { %p1653_p3 = scmp.lt.u32.totalorder %s1649_s19, %s1844_s3 }
  0x26   :  { %p1655_p4 = pnand %p1653_p3, %p1650_p2 }
  0x28   :  { %1658 = shalt.err (!%p1655_p4)
}
  0x29   :  { %s1659_s24 = scalar_lea.vmem %s43_s15, 4096  ;;  %p1664_p6 = scmp.lt.s32.totalorder %s43_s15, %s43_s15 }
  0x2a   :  { %p1660_p5 = scmp.ne.s32.totalorder %s43_s15, %s1659_s24  ;;  %p1665_p7 = scmp.lt.s32.totalorder %s1659_s24, %s1659_s24 }
  0x2c   :  { %p1666_p8 = por %p1665_p7, %p1664_p6 }
  0x2e   :  { %p1667_p9 = pnand %p1666_p8, %p1660_p5 }
  0x30   :  { %1670 = shalt.err (!%p1667_p9)
}
  0x31   :  { %s1680_s1 = smov 64   ;;  %s1681_s18 = smov 4  }
  0x32   :  { %48 = dma.hbm_to_vmem [thread:$0]  %s1844_s3, 4096, %s43_s15, [#allocation6], %s1680_s1, %s1680_s1, %s1681_s18  }
  0x33   :  { %1671 = dma.done.wait [#allocation4], 4096  }
  0x34   :  { %1672 = vsyncadd [#allocation4], 4294963200 }
  0x35   :  { %1673 = dma.done.wait [#allocation6], 8192  }
  0x36   :  { %1674 = vsyncadd [#allocation6], 4294959104  ;;  %v1682_v0 = vmov 0   ;;  %v1411_v1 = vld [vmem:[#allocation3 + $0x4] ss:$16 sps:$4 sm:$0xff]   ;;  %v1472_v44 = vld [vmem:[%s1841_s0 + $0x8] sm:$0xff]  }
  0x37   :  { %307 = vmatprep.mubr.bf16.mxu0 %v1682_v0  ;;  %360 = vmatprep.mubr.bf16.mxu1 %v1682_v0  ;;  %v1413_v2 = vld [vmem:[#allocation3 + $0xc] ss:$16 sps:$4 sm:$0xff]   ;;  %v1415_v3 = vld [vmem:[#allocation3] ss:$16 sps:$4 sm:$0xff]   ;;  %v1416_v4 = vld [vmem:[#allocation3 + $0x8] ss:$16 sps:$4 sm:$0xff]  }
  0x38   :  { %275 = vmatprep.subr.bf16.mxu0 %v1411_v1  ;;  %328 = vmatprep.subr.bf16.mxu1 %v1413_v2  ;;  %v1417_v5 = vld [vmem:[#allocation3 + $0x24] ss:$16 sps:$4 sm:$0xff]   ;;  %v1419_v6 = vld [vmem:[#allocation3 + $0x2c] ss:$16 sps:$4 sm:$0xff]   ;;  %v1421_v7 = vld [vmem:[#allocation3 + $0x20] ss:$16 sps:$4 sm:$0xff]  }
  0x39   :  { %276 = vmatpush1.bf16.msra.mxu0 %v1415_v3  ;;  %329 = vmatpush1.bf16.msra.mxu1 %v1416_v4  ;;  %v1422_v8 = vld [vmem:[#allocation3 + $0x28] ss:$16 sps:$4 sm:$0xff]   ;;  %v1423_v9 = vld [vmem:[#allocation3 + $0x44] ss:$16 sps:$4 sm:$0xff]   ;;  %v1425_v10 = vld [vmem:[#allocation3 + $0x4c] ss:$16 sps:$4 sm:$0xff]  }
  0x3a   :  { %277 = vmatprep.subr.bf16.mxu0 %v1417_v5  ;;  %330 = vmatprep.subr.bf16.mxu1 %v1419_v6  ;;  %v1427_v11 = vld [vmem:[#allocation3 + $0x40] ss:$16 sps:$4 sm:$0xff]   ;;  %v1428_v12 = vld [vmem:[#allocation3 + $0x48] ss:$16 sps:$4 sm:$0xff]   ;;  %v1429_v13 = vld [vmem:[#allocation3 + $0x64] ss:$16 sps:$4 sm:$0xff]  }
  0x3b   :  { %v1431_v14 = vld [vmem:[#allocation3 + $0x6c] ss:$16 sps:$4 sm:$0xff]   ;;  %v1433_v15 = vld [vmem:[#allocation3 + $0x60] ss:$16 sps:$4 sm:$0xff]   ;;  %v1434_v16 = vld [vmem:[#allocation3 + $0x68] ss:$16 sps:$4 sm:$0xff]  }
  0x3c   :  { %v1435_v17 = vld [vmem:[#allocation3 + $0x84] ss:$16 sps:$4 sm:$0xff]   ;;  %v1437_v18 = vld [vmem:[#allocation3 + $0x8c] ss:$16 sps:$4 sm:$0xff]   ;;  %v1439_v19 = vld [vmem:[#allocation3 + $0x80] ss:$16 sps:$4 sm:$0xff]  }
  0x3d   :  { %278 = vmatpush1.bf16.msra.mxu0 %v1421_v7  ;;  %331 = vmatpush1.bf16.msra.mxu1 %v1422_v8  ;;  %v1440_v20 = vld [vmem:[#allocation3 + $0x88] ss:$16 sps:$4 sm:$0xff]   ;;  %v1441_v21 = vld [vmem:[#allocation3 + $0xa4] ss:$16 sps:$4 sm:$0xff]   ;;  %v1443_v22 = vld [vmem:[#allocation3 + $0xac] ss:$16 sps:$4 sm:$0xff]  }
  0x3e   :  { %279 = vmatprep.subr.bf16.mxu0 %v1423_v9  ;;  %332 = vmatprep.subr.bf16.mxu1 %v1425_v10  ;;  %v1445_v23 = vld [vmem:[#allocation3 + $0xa0] ss:$16 sps:$4 sm:$0xff]   ;;  %v1446_v24 = vld [vmem:[#allocation3 + $0xa8] ss:$16 sps:$4 sm:$0xff]   ;;  %v1447_v25 = vld [vmem:[#allocation3 + $0xc4] ss:$16 sps:$4 sm:$0xff]  }
  0x3f   :  { %v1449_v26 = vld [vmem:[#allocation3 + $0xcc] ss:$16 sps:$4 sm:$0xff]   ;;  %v1451_v27 = vld [vmem:[#allocation3 + $0xc0] ss:$16 sps:$4 sm:$0xff]   ;;  %v1452_v28 = vld [vmem:[#allocation3 + $0xc8] ss:$16 sps:$4 sm:$0xff]  }
  0x40   :  { %v1453_v29 = vld [vmem:[#allocation3 + $0xe4] ss:$16 sps:$4 sm:$0xff]   ;;  %v1455_v30 = vld [vmem:[#allocation3 + $0xec] ss:$16 sps:$4 sm:$0xff]   ;;  %v1457_v31 = vld [vmem:[#allocation3 + $0xe0] ss:$16 sps:$4 sm:$0xff]  }
  0x41   :  { %280 = vmatpush1.bf16.msra.mxu0 %v1427_v11  ;;  %333 = vmatpush1.bf16.msra.mxu1 %v1428_v12  ;;  %v1458_v32 = vld [vmem:[#allocation3 + $0xe8] ss:$16 sps:$4 sm:$0xff]   ;;  %v1462_v33 = vld [vmem:[#allocation5 + $0x4] ss:$16 sps:$4 sm:$0xff]   ;;  %v1465_v34 = vld [vmem:[#allocation5 + $0xc] ss:$16 sps:$4 sm:$0xff]  }
  0x42   :  { %281 = vmatprep.subr.bf16.mxu0 %v1429_v13  ;;  %334 = vmatprep.subr.bf16.mxu1 %v1431_v14  ;;  %v1756_v35 = vld [vmem:[%s1841_s0] sm:$0xff]   ;;  %v1463_v37 = vld [vmem:[#allocation5 + $0x8] ss:$16 sps:$4 sm:$0xff]   ;;  %v1471_v39 = vld [vmem:[#allocation5 + $0x2c] ss:$16 sps:$4 sm:$0xff]  }
  0x43   :  { %v1460_v36 = vld [vmem:[#allocation5] ss:$16 sps:$4 sm:$0xff]   ;;  %v1468_v38 = vld [vmem:[#allocation5 + $0x24] ss:$16 sps:$4 sm:$0xff]   ;;  %v1469_v41 = vld [vmem:[#allocation5 + $0x28] ss:$16 sps:$4 sm:$0xff]  }
  0x44   :  { %v1466_v40 = vld [vmem:[#allocation5 + $0x20] ss:$16 sps:$4 sm:$0xff]   ;;  %v1475_v42 = vld [vmem:[#allocation5 + $0x44] ss:$16 sps:$4 sm:$0xff]   ;;  %v1478_v43 = vld [vmem:[#allocation5 + $0x4c] ss:$16 sps:$4 sm:$0xff]  }
  0x45   :  { %282 = vmatpush1.bf16.msra.mxu0 %v1433_v15  ;;  %335 = vmatpush1.bf16.msra.mxu1 %v1434_v16  ;;  %v1473_v45 = vld [vmem:[#allocation5 + $0x40] ss:$16 sps:$4 sm:$0xff]   ;;  %v1476_v46 = vld [vmem:[#allocation5 + $0x48] ss:$16 sps:$4 sm:$0xff]   ;;  %v1481_v47 = vld [vmem:[#allocation5 + $0x64] ss:$16 sps:$4 sm:$0xff]  }
  0x46   :  { %283 = vmatprep.subr.bf16.mxu0 %v1435_v17  ;;  %336 = vmatprep.subr.bf16.mxu1 %v1437_v18  ;;  %v1484_v48 = vld [vmem:[#allocation5 + $0x6c] ss:$16 sps:$4 sm:$0xff]   ;;  %v1479_v49 = vld [vmem:[#allocation5 + $0x60] ss:$16 sps:$4 sm:$0xff]   ;;  %v1482_v50 = vld [vmem:[#allocation5 + $0x68] ss:$16 sps:$4 sm:$0xff]  }
  0x47   :  { %v1487_v51 = vld [vmem:[#allocation5 + $0x84] ss:$16 sps:$4 sm:$0xff]   ;;  %v1490_v52 = vld [vmem:[#allocation5 + $0x8c] ss:$16 sps:$4 sm:$0xff]   ;;  %v1485_v53 = vld [vmem:[#allocation5 + $0x80] ss:$16 sps:$4 sm:$0xff]  }
  0x48   :  { %v1488_v54 = vld [vmem:[#allocation5 + $0x88] ss:$16 sps:$4 sm:$0xff]   ;;  %v1493_v55 = vld [vmem:[#allocation5 + $0xa4] ss:$16 sps:$4 sm:$0xff]   ;;  %v1496_v56 = vld [vmem:[#allocation5 + $0xac] ss:$16 sps:$4 sm:$0xff]  }
  0x49   :  { %284 = vmatpush1.bf16.msra.mxu0 %v1439_v19  ;;  %337 = vmatpush1.bf16.msra.mxu1 %v1440_v20  ;;  %v1491_v57 = vld [vmem:[#allocation5 + $0xa0] ss:$16 sps:$4 sm:$0xff]   ;;  %v1494_v58 = vld [vmem:[#allocation5 + $0xa8] ss:$16 sps:$4 sm:$0xff]   ;;  %v1499_v59 = vld [vmem:[#allocation5 + $0xc4] ss:$16 sps:$4 sm:$0xff]  }
  0x4a   :  { %285 = vmatprep.subr.bf16.mxu0 %v1441_v21  ;;  %338 = vmatprep.subr.bf16.mxu1 %v1443_v22  ;;  %v1502_v60 = vld [vmem:[#allocation5 + $0xcc] ss:$16 sps:$4 sm:$0xff]   ;;  %v1497_v61 = vld [vmem:[#allocation5 + $0xc0] ss:$16 sps:$4 sm:$0xff]   ;;  %v1500_v62 = vld [vmem:[#allocation5 + $0xc8] ss:$16 sps:$4 sm:$0xff]  }
  0x4b   :  { %v1505_v63 = vld [vmem:[#allocation5 + $0xe4] ss:$16 sps:$4 sm:$0xff]   ;;  %v1508_v1 = vld [vmem:[#allocation5 + $0xec] ss:$16 sps:$4 sm:$0xff]   ;;  %v1503_v2 = vld [vmem:[#allocation5 + $0xe0] ss:$16 sps:$4 sm:$0xff]  }
  0x4c   :  { %v1506_v3 = vld [vmem:[#allocation5 + $0xe8] ss:$16 sps:$4 sm:$0xff]   ;;  %v1509_v4 = vld [vmem:[#allocation7 + $0x40] sm:$0xff]   ;;  %v1517_v12 = vld [vmem:[#allocation7 + $0x50] sm:$0xff]  }
  0x4d   :  { %286 = vmatpush1.bf16.msra.mxu0 %v1445_v23  ;;  %339 = vmatpush1.bf16.msra.mxu1 %v1446_v24  ;;  %v1510_v5 = vld [vmem:[#allocation7 + $0xc0] sm:$0xff]   ;;  %v1513_v8 = vld [vmem:[#allocation7 + $0x48] sm:$0xff]   ;;  %v1519_v13 = vld [vmem:[#allocation7 + $0x10] sm:$0xff]  }
  0x4e   :  { %287 = vmatprep.subr.bf16.mxu0 %v1447_v25  ;;  %340 = vmatprep.subr.bf16.mxu1 %v1449_v26  ;;  %v1511_v6 = vld [vmem:[#allocation7] sm:$0xff]   ;;  %v1514_v9 = vld [vmem:[#allocation7 + $0xc8] sm:$0xff]   ;;  %v1520_v14 = vld [vmem:[#allocation7 + $0x90] sm:$0xff]  }
  0x4f   :  { %v1512_v7 = vld [vmem:[#allocation7 + $0x80] sm:$0xff]   ;;  %v1515_v10 = vld [vmem:[#allocation7 + $0x8] sm:$0xff]   ;;  %v1521_v15 = vld [vmem:[#allocation7 + $0x58] sm:$0xff]  }
  0x50   :  { %v1516_v11 = vld [vmem:[#allocation7 + $0x88] sm:$0xff]   ;;  %v1522_v16 = vld [vmem:[#allocation7 + $0xd8] sm:$0xff]   ;;  %v1525_v19 = vld [vmem:[#allocation7 + $0x60] sm:$0xff]  }
  0x51   :  { %288 = vmatpush1.bf16.msra.mxu0 %v1451_v27  ;;  %341 = vmatpush1.bf16.msra.mxu1 %v1452_v28  ;;  %v1523_v17 = vld [vmem:[#allocation7 + $0x18] sm:$0xff]   ;;  %v1526_v20 = vld [vmem:[#allocation7 + $0xe0] sm:$0xff]   ;;  %v1529_v23 = vld [vmem:[#allocation7 + $0x68] sm:$0xff]  }
  0x52   :  { %289 = vmatprep.subr.bf16.mxu0 %v1453_v29  ;;  %342 = vmatprep.subr.bf16.mxu1 %v1455_v30  ;;  %v1524_v18 = vld [vmem:[#allocation7 + $0x98] sm:$0xff]   ;;  %v1527_v21 = vld [vmem:[#allocation7 + $0x20] sm:$0xff]   ;;  %v1530_v24 = vld [vmem:[#allocation7 + $0xe8] sm:$0xff]  }
  0x53   :  { %v1528_v22 = vld [vmem:[#allocation7 + $0xa0] sm:$0xff]   ;;  %v1531_v25 = vld [vmem:[#allocation7 + $0x28] sm:$0xff]   ;;  %v1533_v27 = vld [vmem:[#allocation7 + $0x70] sm:$0xff]  }
  0x54   :  { %v1532_v26 = vld [vmem:[#allocation7 + $0xa8] sm:$0xff]   ;;  %v1534_v28 = vld [vmem:[#allocation7 + $0xf0] sm:$0xff]  }
  0x55   :  { %290 = vmatpush1.bf16.msra.mxu0 %v1457_v31  ;;  %343 = vmatpush1.bf16.msra.mxu1 %v1458_v32  ;;  %v1535_v29 = vld [vmem:[#allocation7 + $0x30] sm:$0xff]   ;;  %v1537_v31 = vld [vmem:[#allocation7 + $0x78] sm:$0xff]  }
  0x56   :  { %685 = vmatprep.subr.bf16.mxu0 %v1462_v33  ;;  %738 = vmatprep.subr.bf16.mxu1 %v1465_v34  ;;  %v1536_v30 = vld [vmem:[#allocation7 + $0xb0] sm:$0xff]   ;;  %v1538_v32 = vld [vmem:[#allocation7 + $0xf8] sm:$0xff]  }
  0x57   :  { %v1539_v33 = vld [vmem:[#allocation7 + $0x38] sm:$0xff]  }
  0x58   :  { %308 = vmatmul.mubr.bf16.vlgmr.msra.gmra.mrb[0].mxu0 %v1756_v35  ;;  %361 = vmatmul.mubr.bf16.vlgmr.msra.gmra.mrb[0].mxu1 %v1756_v35  ;;  %v1540_v34 = vld [vmem:[#allocation7 + $0xb8] sm:$0xff]  }
  0x59   :  { %686 = vmatpush1.bf16.msra.mxu0 %v1460_v36  ;;  %739 = vmatpush1.bf16.msra.mxu1 %v1463_v37 }
  0x5a   :  { %687 = vmatprep.subr.bf16.mxu0 %v1468_v38  ;;  %740 = vmatprep.subr.bf16.mxu1 %v1471_v39 }
  0x5b   :  { %317 = vmatprep.mubr.bf16.mxu0 %v1682_v0  ;;  %370 = vmatprep.mubr.bf16.mxu1 %v1682_v0 }
  0x5d   :  { %688 = vmatpush1.bf16.msra.mxu0 %v1466_v40  ;;  %741 = vmatpush1.bf16.msra.mxu1 %v1469_v41 }
  0x5e   :  { %689 = vmatprep.subr.bf16.mxu0 %v1475_v42  ;;  %742 = vmatprep.subr.bf16.mxu1 %v1478_v43 }
  0x60   :  { %318 = vmatmul.mubr.bf16.gmra.mrb[4].mxu0 %v1472_v44  ;;  %371 = vmatmul.mubr.bf16.gmra.mrb[4].mxu1 %v1472_v44 }
  0x61   :  { %690 = vmatpush1.bf16.msra.mxu0 %v1473_v45  ;;  %743 = vmatpush1.bf16.msra.mxu1 %v1476_v46 }
  0x62   :  { %691 = vmatprep.subr.bf16.mxu0 %v1481_v47  ;;  %744 = vmatprep.subr.bf16.mxu1 %v1484_v48 }
  0x63   :  { %717 = vmatprep.mubr.bf16.mxu0 %v1682_v0  ;;  %770 = vmatprep.mubr.bf16.mxu1 %v1682_v0 }
  0x65   :  { %692 = vmatpush1.bf16.msra.mxu0 %v1479_v49  ;;  %745 = vmatpush1.bf16.msra.mxu1 %v1482_v50 }
  0x66   :  { %693 = vmatprep.subr.bf16.mxu0 %v1487_v51  ;;  %746 = vmatprep.subr.bf16.mxu1 %v1490_v52 }
  0x69   :  { %694 = vmatpush1.bf16.msra.mxu0 %v1485_v53  ;;  %747 = vmatpush1.bf16.msra.mxu1 %v1488_v54 }
  0x6a   :  { %695 = vmatprep.subr.bf16.mxu0 %v1493_v55  ;;  %748 = vmatprep.subr.bf16.mxu1 %v1496_v56 }
  0x6d   :  { %696 = vmatpush1.bf16.msra.mxu0 %v1491_v57  ;;  %749 = vmatpush1.bf16.msra.mxu1 %v1494_v58 }
  0x6e   :  { %697 = vmatprep.subr.bf16.mxu0 %v1499_v59  ;;  %750 = vmatprep.subr.bf16.mxu1 %v1502_v60 }
  0x71   :  { %698 = vmatpush1.bf16.msra.mxu0 %v1497_v61  ;;  %751 = vmatpush1.bf16.msra.mxu1 %v1500_v62 }
  0x72   :  { %699 = vmatprep.subr.bf16.mxu0 %v1505_v63  ;;  %752 = vmatprep.subr.bf16.mxu1 %v1508_v1 }
  0x75   :  { %700 = vmatpush1.bf16.msra.mxu0 %v1503_v2  ;;  %753 = vmatpush1.bf16.msra.mxu1 %v1506_v3 }
  0x76   :  { %1347 = vmatprep.subr.bf16.mxu0 %v1509_v4  ;;  %1375 = vmatprep.subr.bf16.mxu1 %v1510_v5 }
  0x78   :  { %718 = vmatmul.mubr.bf16.vlgmr.msra.gmra.mrb[8].mxu0 %v1756_v35  ;;  %771 = vmatmul.mubr.bf16.vlgmr.msra.gmra.mrb[8].mxu1 %v1756_v35 }
  0x79   :  { %727 = vmatprep.mubr.bf16.mxu0 %v1682_v0  ;;  %780 = vmatprep.mubr.bf16.mxu1 %v1682_v0  ;;  %v1518_v0 = vld [vmem:[#allocation7 + $0xd0] sm:$0xff]  }
  0x7a   :  { %1348 = vmatpush3.bf16.msra.mxu0 %v1511_v6  ;;  %1376 = vmatpush3.bf16.msra.mxu1 %v1512_v7 }
  0x7b   :  { %1349 = vmatprep.subr.bf16.mxu0 %v1513_v8  ;;  %1377 = vmatprep.subr.bf16.mxu1 %v1514_v9 }
  0x7e   :  { %1350 = vmatpush3.bf16.msra.mxu0 %v1515_v10  ;;  %1378 = vmatpush3.bf16.msra.mxu1 %v1516_v11 }
  0x7f   :  { %1351 = vmatprep.subr.bf16.mxu0 %v1517_v12  ;;  %1379 = vmatprep.subr.bf16.mxu1 %v1518_v0 }
  0x80   :  { %728 = vmatmul.mubr.bf16.gmra.mrb[12].mxu0 %v1472_v44  ;;  %781 = vmatmul.mubr.bf16.gmra.mrb[12].mxu1 %v1472_v44 }
  0x82   :  { %1352 = vmatpush3.bf16.msra.mxu0 %v1519_v13  ;;  %1380 = vmatpush3.bf16.msra.mxu1 %v1520_v14 }
  0x83   :  { %1353 = vmatprep.subr.bf16.mxu0 %v1521_v15  ;;  %1381 = vmatprep.subr.bf16.mxu1 %v1522_v16 }
  0x86   :  { %1354 = vmatpush3.bf16.msra.mxu0 %v1523_v17  ;;  %1382 = vmatpush3.bf16.msra.mxu1 %v1524_v18 }
  0x87   :  { %1355 = vmatprep.subr.bf16.mxu0 %v1525_v19  ;;  %1383 = vmatprep.subr.bf16.mxu1 %v1526_v20 }
  0x8a   :  { %1356 = vmatpush3.bf16.msra.mxu0 %v1527_v21  ;;  %1384 = vmatpush3.bf16.msra.mxu1 %v1528_v22 }
  0x8b   :  { %1357 = vmatprep.subr.bf16.mxu0 %v1529_v23  ;;  %1385 = vmatprep.subr.bf16.mxu1 %v1530_v24 }
  0x8e   :  { %1358 = vmatpush3.bf16.msra.mxu0 %v1531_v25  ;;  %1386 = vmatpush3.bf16.msra.mxu1 %v1532_v26 }
  0x8f   :  { %1359 = vmatprep.subr.bf16.mxu0 %v1533_v27  ;;  %1387 = vmatprep.subr.bf16.mxu1 %v1534_v28 }
  0x92   :  { %1360 = vmatpush3.bf16.msra.mxu0 %v1535_v29  ;;  %1388 = vmatpush3.bf16.msra.mxu1 %v1536_v30 }
  0x93   :  { %1361 = vmatprep.subr.bf16.mxu0 %v1537_v31  ;;  %1389 = vmatprep.subr.bf16.mxu1 %v1538_v32 }
  0x96   :  { %1362 = vmatpush3.bf16.msra.mxu0 %v1539_v33  ;;  %1390 = vmatpush3.bf16.msra.mxu1 %v1540_v34 }
 0x12b   :  { %v1771_v35 = vpop.f32.mrb[0].mxu0  ;;  %v1773_v36 = vpop.f32.mrb[0].mxu1 }
 0x12c   :  { %v1248_v37 = vmul.f32 -1.442695, %v1771_v35  ;;  %v1250_v38 = vmul.f32 -1.442695, %v1773_v36  ;;  %v1777_v39 = vpop.f32.mrb[1].mxu0  ;;  %v1779_v40 = vpop.f32.mrb[1].mxu1 }
 0x12d   :  { %v1249_v41 = vmul.f32 -1.442695, %v1777_v39  ;;  %v1251_v42 = vmul.f32 -1.442695, %v1779_v40  ;;  %v1783_v43 = vpop.f32.mrb[2].mxu0  ;;  %v1785_v44 = vpop.f32.mrb[2].mxu1 }
 0x12e   :  { %1541 = vpow2.f32 %v1248_v37  ;;  %v1252_v45 = vmul.f32 -1.442695, %v1783_v43  ;;  %v1788_v46 = vpop.f32.mrb[3].mxu0  ;;  %v1790_v47 = vpop.f32.mrb[3].mxu1  ;;  %v1254_v48 = vmul.f32 -1.442695, %v1785_v44 }
 0x12f   :  { %1543 = vpow2.f32 %v1250_v38  ;;  %v1253_v49 = vmul.f32 -1.442695, %v1788_v46  ;;  %v1255_v50 = vmul.f32 -1.442695, %v1790_v47 }
 0x130   :  { %1545 = vpow2.f32 %v1249_v41 }
 0x131   :  { %1547 = vpow2.f32 %v1251_v42 }
 0x132   :  { %1549 = vpow2.f32 %v1252_v45 }
 0x133   :  { %1551 = vpow2.f32 %v1254_v48  ;;  %v1795_v51 = vpop.f32.mrb[4].mxu0  ;;  %v1797_v52 = vpop.f32.mrb[4].mxu1 }
 0x134   :  { %1553 = vpow2.f32 %v1253_v49  ;;  %v1256_v53 = vmul.f32 -1.442695, %v1795_v51  ;;  %v1258_v54 = vmul.f32 -1.442695, %v1797_v52  ;;  %v1801_v55 = vpop.f32.mrb[5].mxu0  ;;  %v1803_v56 = vpop.f32.mrb[5].mxu1 }
 0x135   :  { %1555 = vpow2.f32 %v1255_v50  ;;  %v1257_v57 = vmul.f32 -1.442695, %v1801_v55  ;;  %v1259_v58 = vmul.f32 -1.442695, %v1803_v56  ;;  %v1807_v59 = vpop.f32.mrb[6].mxu0  ;;  %v1809_v60 = vpop.f32.mrb[6].mxu1 }
 0x136   :  { %1557 = vpow2.f32 %v1256_v53  ;;  %v1260_v61 = vmul.f32 -1.442695, %v1807_v59  ;;  %v1812_v62 = vpop.f32.mrb[7].mxu0  ;;  %v1814_v63 = vpop.f32.mrb[7].mxu1  ;;  %v1262_v25 = vmul.f32 -1.442695, %v1809_v60 }
 0x137   :  { %1559 = vpow2.f32 %v1258_v54  ;;  %v1261_v28 = vmul.f32 -1.442695, %v1812_v62  ;;  %v1263_v30 = vmul.f32 -1.442695, %v1814_v63 }
 0x138   :  { %v1542_v1 = vpop.eup %1541  ;;  %1561 = vpow2.f32 %v1257_v57 }
 0x139   :  { %v1544_v2 = vpop.eup %1543  ;;  %v429_v3 = vadd.f32 1.0, %v1542_v1  ;;  %1563 = vpow2.f32 %v1259_v58 }
 0x13a   :  { %v1546_v4 = vpop.eup %1545  ;;  %v431_v5 = vadd.f32 1.0, %v1544_v2  ;;  %1565 = vpow2.f32 %v1260_v61 }
 0x13b   :  { %v1548_v6 = vpop.eup %1547  ;;  %1567 = vrcp.f32 %v429_v3  ;;  %v430_v7 = vadd.f32 1.0, %v1546_v4 }
 0x13c   :  { %v1550_v8 = vpop.eup %1549  ;;  %1569 = vrcp.f32 %v431_v5  ;;  %v432_v9 = vadd.f32 1.0, %v1548_v6 }
 0x13d   :  { %v1552_v10 = vpop.eup %1551  ;;  %1571 = vrcp.f32 %v430_v7  ;;  %v433_v11 = vadd.f32 1.0, %v1550_v8 }
 0x13e   :  { %v1554_v12 = vpop.eup %1553  ;;  %1573 = vrcp.f32 %v432_v9  ;;  %v435_v0 = vadd.f32 1.0, %v1552_v10 }
 0x13f   :  { %v1556_v13 = vpop.eup %1555  ;;  %1575 = vrcp.f32 %v433_v11  ;;  %v434_v14 = vadd.f32 1.0, %v1554_v12 }
 0x140   :  { %v1558_v15 = vpop.eup %1557  ;;  %1577 = vrcp.f32 %v435_v0  ;;  %v436_v16 = vadd.f32 1.0, %v1556_v13 }
 0x141   :  { %v1560_v17 = vpop.eup %1559  ;;  %1579 = vrcp.f32 %v434_v14  ;;  %v437_v18 = vadd.f32 1.0, %v1558_v15 }
 0x142   :  { %v1562_v19 = vpop.eup %1561  ;;  %1581 = vrcp.f32 %v436_v16  ;;  %v439_v20 = vadd.f32 1.0, %v1560_v17 }
 0x143   :  { %v1564_v21 = vpop.eup %1563  ;;  %1583 = vrcp.f32 %v437_v18  ;;  %v438_v22 = vadd.f32 1.0, %v1562_v19 }
 0x144   :  { %v1566_v23 = vpop.eup %1565  ;;  %1585 = vrcp.f32 %v439_v20  ;;  %v440_v24 = vadd.f32 1.0, %v1564_v21 }
 0x145   :  { %v1568_v26 = vpop.eup %1567  ;;  %1587 = vrcp.f32 %v438_v22  ;;  %v441_v27 = vadd.f32 1.0, %v1566_v23 }
 0x146   :  { %v1570_v29 = vpop.eup %1569  ;;  %1589 = vrcp.f32 %v440_v24  ;;  %v477_v37 = vmul.f32 %v1568_v26, %v1771_v35 }
 0x147   :  { %v1572_v31 = vpop.eup %1571  ;;  %1591 = vrcp.f32 %v441_v27  ;;  %v479_v38 = vmul.f32 %v1570_v29, %v1773_v36 }
 0x148   :  { %v1574_v32 = vpop.eup %1573  ;;  %1593 = vpow2.f32 %v1262_v25  ;;  %v478_v42 = vmul.f32 %v1572_v31, %v1777_v39 }
 0x149   :  { %v1576_v33 = vpop.eup %1575  ;;  %1595 = vpow2.f32 %v1261_v28  ;;  %v480_v45 = vmul.f32 %v1574_v32, %v1779_v40 }
 0x14a   :  { %v1578_v34 = vpop.eup %1577  ;;  %1597 = vpow2.f32 %v1263_v30  ;;  %v481_v53 = vmul.f32 %v1576_v33, %v1783_v43 }
 0x14b   :  { %v1580_v41 = vpop.eup %1579  ;;  %v719_v48 = vpop.f32.mrb[8].mxu0  ;;  %v483_v54 = vmul.f32 %v1578_v34, %v1785_v44 }
 0x14c   :  { %v772_v49 = vpop.f32.mrb[8].mxu1  ;;  %v1582_v50 = vpop.eup %1581  ;;  %v791_v57 = vmul.f32 %v719_v48, %v477_v37  ;;  %v482_v36 = vmul.f32 %v1580_v41, %v1788_v46 }
 0x14d   :  { %v793_v58 = vmul.f32 %v772_v49, %v479_v38  ;;  %v721_v61 = vpop.f32.mrb[9].mxu0  ;;  %v774_v1 = vpop.f32.mrb[9].mxu1  ;;  %v484_v2 = vmul.f32 %v1582_v50, %v1790_v47 }
 0x14e   :  { %v1584_v35 = vpop.eup %1583  ;;  %v792_v3 = vmul.f32 %v721_v61, %v478_v42  ;;  %v794_v39 = vmul.f32 %v774_v1, %v480_v45  ;;  %v723_v4 = vpop.f32.mrb[10].mxu0 }
 0x14f   :  { %v776_v40 = vpop.f32.mrb[10].mxu1  ;;  %v1586_v5 = vpop.eup %1585  ;;  %v795_v6 = vmul.f32 %v723_v4, %v481_v53  ;;  %v485_v47 = vmul.f32 %v1584_v35, %v1795_v51 }
 0x150   :  { %v797_v7 = vmul.f32 %v776_v40, %v483_v54  ;;  %v725_v8 = vpop.f32.mrb[11].mxu0  ;;  %v778_v43 = vpop.f32.mrb[11].mxu1  ;;  %v487_v16 = vmul.f32 %v1586_v5, %v1797_v52 }
 0x151   :  { %v1588_v9 = vpop.eup %1587  ;;  %v796_v44 = vmul.f32 %v725_v8, %v482_v36  ;;  %v798_v10 = vmul.f32 %v778_v43, %v484_v2  ;;  %v811_v12 = vpack.c.bf16 %v795_v6, %v791_v57 }
 0x152   :  { %v1590_v11 = vpop.eup %1589  ;;  %v813_v0 = vpack.c.bf16 %v797_v7, %v793_v58  ;;  %v486_v18 = vmul.f32 %v1588_v9, %v1801_v55 }
 0x153   :  { %v1592_v13 = vpop.eup %1591  ;;  %v812_v14 = vpack.c.bf16 %v796_v44, %v792_v3  ;;  %v814_v46 = vpack.c.bf16 %v798_v10, %v794_v39  ;;  %v488_v19 = vmul.f32 %v1590_v11, %v1803_v56  ;;  %v729_v21 = vpop.f32.mrb[12].mxu0 }
 0x154   :  { %v1594_v15 = vpop.eup %1593  ;;  %v782_v22 = vpop.f32.mrb[12].mxu1  ;;  %v489_v24 = vmul.f32 %v1592_v13, %v1807_v59  ;;  %v799_v26 = vmul.f32 %v729_v21, %v485_v47 }
 0x155   :  { %v1596_v17 = vpop.eup %1595  ;;  %v443_v20 = vadd.f32 1.0, %v1594_v15  ;;  %1107 = vmatprep.mubr.bf16.mxu0 %v812_v14  ;;  %1156 = vmatprep.mubr.bf16.mxu1 %v814_v46  ;;  %v801_v27 = vmul.f32 %v782_v22, %v487_v16  ;;  %v731_v28 = vpop.f32.mrb[13].mxu0 }
 0x156   :  { %v1598_v23 = vpop.eup %1597  ;;  %v442_v25 = vadd.f32 1.0, %v1596_v17  ;;  %v784_v51 = vpop.f32.mrb[13].mxu1  ;;  %1108 = vmatmul.mubr.bf16.vlgmr.msra.gmra.mrb[16].mxu0 %v811_v12  ;;  %1157 = vmatmul.mubr.bf16.vlgmr.msra.gmra.mrb[16].mxu1 %v813_v0  ;;  %v800_v55 = vmul.f32 %v731_v28, %v486_v18 }
 0x157   :  { %1599 = vrcp.f32 %v443_v20  ;;  %v444_v52 = vadd.f32 1.0, %v1598_v23  ;;  %v802_v29 = vmul.f32 %v784_v51, %v488_v19  ;;  %v733_v56 = vpop.f32.mrb[14].mxu0  ;;  %v786_v30 = vpop.f32.mrb[14].mxu1 }
 0x158   :  { %1601 = vrcp.f32 %v442_v25  ;;  %v803_v31 = vmul.f32 %v733_v56, %v489_v24  ;;  %v735_v32 = vpop.f32.mrb[15].mxu0  ;;  %v788_v33 = vpop.f32.mrb[15].mxu1 }
 0x159   :  { %1603 = vrcp.f32 %v444_v52 }
 0x15a   :  { %v815_v34 = vpack.c.bf16 %v803_v31, %v799_v26 }
 0x161   :  { %v1600_v59 = vpop.eup %1599 }
 0x162   :  { %v1602_v37 = vpop.eup %1601  ;;  %v491_v38 = vmul.f32 %v1600_v59, %v1809_v60 }
 0x163   :  { %v1604_v41 = vpop.eup %1603  ;;  %v490_v42 = vmul.f32 %v1602_v37, %v1812_v62 }
 0x164   :  { %v492_v45 = vmul.f32 %v1604_v41, %v1814_v63  ;;  %v805_v48 = vmul.f32 %v786_v30, %v491_v38 }
 0x165   :  { %v804_v49 = vmul.f32 %v735_v32, %v490_v42 }
 0x166   :  { %v817_v50 = vpack.c.bf16 %v805_v48, %v801_v27  ;;  %v806_v53 = vmul.f32 %v788_v33, %v492_v45 }
 0x167   :  { %v816_v54 = vpack.c.bf16 %v804_v49, %v800_v55 }
 0x168   :  { %v818_v57 = vpack.c.bf16 %v806_v53, %v802_v29 }
 0x169   :  { %1115 = vmatprep.mubr.bf16.mxu0 %v816_v54 }
 0x16a   :  { %1164 = vmatprep.mubr.bf16.mxu1 %v818_v57  ;;  %1116 = vmatmul.mubr.bf16.gmra.mrb[20].mxu0 %v815_v34 }
 0x16b   :  { %1165 = vmatmul.mubr.bf16.gmra.mrb[20].mxu1 %v817_v50 }
 0x229   :  { %v1363_v58 = vpop.f32.mrb[16].mxu0  ;;  %v1391_v61 = vpop.f32.mrb[16].mxu1 }
 0x22a   :  { %v1364_v1 = vpop.f32.mrb[17].mxu0  ;;  %v1392_v35 = vpop.f32.mrb[17].mxu1 }
 0x22b   :  { %v1365_v60 = vadd.f32 %v1364_v1, %v1363_v58  ;;  %v1393_v36 = vadd.f32 %v1392_v35, %v1391_v61  ;;  %v1366_v2 = vpop.f32.mrb[18].mxu0  ;;  %v1394_v62 = vpop.f32.mrb[18].mxu1 }
 0x22c   :  { %v1367_v3 = vpop.f32.mrb[19].mxu0  ;;  %v1395_v63 = vpop.f32.mrb[19].mxu1 }
 0x22d   :  { %v1159_v39 = vadd.f32 %v1393_v36, %v1365_v60  ;;  %v1368_v4 = vadd.f32 %v1367_v3, %v1366_v2  ;;  %v1396_v40 = vadd.f32 %v1395_v63, %v1394_v62 }
 0x22f   :  { %v1162_v5 = vadd.f32 %v1396_v40, %v1368_v4 }
 0x231   :  { %v1339_v6 = vpack.c.bf16 %v1162_v5, %v1159_v39 }
 0x233   :  { %1340 = vst [vmem:[%s1845_s4] sm:$0xff] %v1339_v6  }
 0x23d   :  { %v1369_v7 = vpop.f32.mrb[20].mxu0 }
 0x23e   :  { %v1397_v8 = vpop.f32.mrb[20].mxu1  ;;  %v1370_v43 = vpop.f32.mrb[21].mxu0 }
 0x23f   :  { %v1371_v9 = vadd.f32 %v1370_v43, %v1369_v7  ;;  %v1398_v44 = vpop.f32.mrb[21].mxu1  ;;  %v1372_v10 = vpop.f32.mrb[22].mxu0 }
 0x240   :  { %v1399_v11 = vadd.f32 %v1398_v44, %v1397_v8  ;;  %v1400_v12 = vpop.f32.mrb[22].mxu1  ;;  %v1373_v0 = vpop.f32.mrb[23].mxu0 }
 0x241   :  { %v1374_v13 = vadd.f32 %v1373_v0, %v1372_v10  ;;  %v1401_v14 = vpop.f32.mrb[23].mxu1 }
 0x242   :  { %v1167_v46 = vadd.f32 %v1399_v11, %v1371_v9  ;;  %v1402_v15 = vadd.f32 %v1401_v14, %v1400_v12 }
 0x244   :  { %v1170_v47 = vadd.f32 %v1402_v15, %v1374_v13 }
 0x246   :  { %v1344_v16 = vpack.c.bf16 %v1170_v47, %v1167_v46 }
 0x248   :  { %1346 = vst [vmem:[%s1845_s4 + $0x8] sm:$0xff] %v1344_v16  }
 0x249   :  { %1212 = vsyncpa [#allocation4], 1 }
 0x24a   :  { %1213 = vsyncpa [#allocation6], 1 }

</bundles_post_ra>
